<compile_context>
chip_gen: v7x
topology: tpu7x:2x2x1
jax: 0.10.0
libtpu: 0.0.40
codegen_flags: <defaults>
</compile_context>

<pallas_src>
import functools

import jax
import jax.numpy as jnp
from jax.experimental import pallas as pl
from jax.experimental.pallas import tpu as pltpu


# ---------------------------------------------------------------------------
# Fused decoder matmul + shifted cross-entropy (mean reduction)
# ---------------------------------------------------------------------------
def _fused_decoder_ce_kernel(labels_ref, x_ref, w_ref, out_ref, loss_ref,
                             acc_ref, *, inv_n):
    i = pl.program_id(0)

    @pl.when(i == 0)
    def _():
        acc_ref[...] = jnp.zeros_like(acc_ref)

    # MXU matmul: [tm, K] (bf16) x [K, V] (bf16) -> [tm, V] f32.
    logits = jnp.dot(x_ref[...], w_ref[...],
                     preferred_element_type=jnp.float32)
    out_ref[...] = logits.astype(out_ref.dtype)

    # Cross-entropy on this tile, f32 math. labels == -1 marks positions that
    # are excluded by the shift (each sequence's last token and any pad rows).
    labels = labels_ref[...]                                  # [tm, 1] int32
    valid = labels >= 0
    tm, v = logits.shape
    row_max = jnp.max(logits, axis=-1, keepdims=True)
    lse = row_max + jnp.log(
        jnp.sum(jnp.exp(logits - row_max), axis=-1, keepdims=True))
    col = jax.lax.broadcasted_iota(jnp.int32, (tm, v), 1)
    picked = jnp.sum(jnp.where(col == labels, logits, 0.0),
                     axis=-1, keepdims=True)                  # logits[i, lbl_i]
    per_row = jnp.where(valid, lse - picked, 0.0)             # [tm, 1]
    acc_ref[...] += jnp.sum(per_row, axis=0, keepdims=True)   # [1, 1]

    @pl.when(i == pl.num_programs(0) - 1)
    def _():
        # exact mean: multiply by 1/n folded in at trace time (no divide).
        loss_ref[...] = acc_ref[...] * inv_n


def fused_decoder_ce(x, w, labels, *, inv_n, out_dtype=jnp.float32):
    """x: [M, K] bf16, w: [K, V] bf16, labels: [M] int32 (-1 = ignore).

    Returns (mean NLL scalar, logits [M, V] f32).
    """
    M, K = x.shape
    K2, V = w.shape
    assert K == K2
    # Row tiling: single full block for small M (toy shapes -> grid of 1, no
    # pipeline overhead), 256-row tiles otherwise. Pad M up if needed.
    tm = M if M <= 256 else 256
    m_pad = ((M + tm - 1) // tm) * tm
    if m_pad != M:
        x = jnp.pad(x, ((0, m_pad - M), (0, 0)))
        labels = jnp.pad(labels, (0, m_pad - M), constant_values=-1)
    labels2 = labels.reshape(m_pad, 1).astype(jnp.int32)

    # TODO(synk): for realistic vocab sizes (V ~ 50k) the [tm, V] logits block
    # must additionally be tiled over V with an online max/LSE to stay inside
    # v7x's 64 MiB VMEM; at V=256 a full-vocab block is optimal.
    kernel = functools.partial(_fused_decoder_ce_kernel, inv_n=inv_n)
    logits, loss = pl.pallas_call(
        kernel,
        out_shape=(jax.ShapeDtypeStruct((m_pad, V), out_dtype),
                   jax.ShapeDtypeStruct((1, 1), jnp.float32)),
        grid_spec=pltpu.PrefetchScalarGridSpec(
            num_scalar_prefetch=0,
            grid=(m_pad // tm,),
            in_specs=[pl.BlockSpec((tm, 1), lambda i: (i, 0)),   # labels
                      pl.BlockSpec((tm, K), lambda i: (i, 0)),   # activations
                      pl.BlockSpec((K, V), lambda i: (0, 0))],   # weight (resident)
            out_specs=(pl.BlockSpec((tm, V), lambda i: (i, 0)),  # decoded tile
                       pl.BlockSpec((1, 1), lambda i: (0, 0))),  # loss (resident)
            scratch_shapes=[pltpu.VMEM((1, 1), jnp.float32)]),
        compiler_params=pltpu.CompilerParams(
            # loss accumulates across the row-tile axis -> reduction axis.
            dimension_semantics=("arbitrary",)),
    )(labels2, x, w)
    return loss[0, 0], logits[:M]


# ---------------------------------------------------------------------------
# server module (forward pass only), parameters built deterministically
# ---------------------------------------------------------------------------
class ServerPallas:
    def __init__(self, key, *, vocab_size=256, pre_dim=32, final_dim=64,
                 padding=True, interpolate=True):
        assert padding and interpolate  # config defaults of the torch module
        self.vocab_size = vocab_size
        self.pre_dim = pre_dim        # pre_model.config.hidden_size
        self.final_dim = final_dim    # bittensor.__network_dim__
        k_emb, k_dec = jax.random.split(key)
        # TODO(synk): the HF pretrained pre_model (gpt2) has no in-script
        # equivalent; its last_hidden_state is stood in by a deterministic
        # token embedding table.
        self.embedding = 0.02 * jax.random.normal(
            k_emb, (vocab_size, pre_dim), jnp.float32)
        # decoder = nn.Linear(final_dim, vocab_size, bias=False); stored
        # transposed as [final_dim, vocab].
        self.decoder_w = 0.02 * jax.random.normal(
            k_dec, (final_dim, vocab_size), jnp.float32)
        # F.pad puts zeros in columns [0, pad_l) and [pad_l+pre_dim, final_dim),
        # so only these weight rows ever multiply non-zero activations.
        self.pad_l = (self.final_dim - self.pre_dim) // 2
        self.pad_r = self.final_dim - self.pre_dim - self.pad_l
        self.decoder_w_active = self.decoder_w[
            self.pad_l:self.pad_l + self.pre_dim, :].astype(jnp.bfloat16)

    # token_remap: tokenizer decode/re-encode has no tensor equivalent -> identity.
    def token_remap(self, inputs):
        return inputs

    def _down(self, inputs):
        """pre_model + nearest interpolation back to the input seq length."""
        B, S = inputs.shape
        remapped = self.token_remap(inputs)
        pre_hidden = self.embedding[remapped]                 # [B, S', pre_dim]
        s_in = pre_hidden.shape[1]
        idx = (jnp.arange(S) * s_in // S).astype(jnp.int32)   # nearest
        return pre_hidden[:, idx, :]                          # [B, S, pre_dim]

    def encode_forward(self, inputs):
        # Kept for API parity with the torch module; forward() skips the pad
        # and folds it into the decoder matmul algebraically.
        down = self._down(inputs)
        return jnp.pad(down, ((0, 0), (0, 0), (self.pad_l, self.pad_r)))

    def forward(self, inputs):
        B, S = inputs.shape
        down = self._down(inputs)                             # [B, S, pre_dim]
        M = B * S
        x = down.reshape(M, self.pre_dim).astype(jnp.bfloat16)

        # Shifted labels, flattened in the same (b, s) order as the logits
        # rows; -1 masks each sequence's last position (no next token).
        labels = jnp.concatenate(
            [inputs[:, 1:].astype(jnp.int32),
             jnp.full((B, 1), -1, dtype=jnp.int32)], axis=1).reshape(-1)

        inv_n = 1.0 / float(B * (S - 1))
        loss, logits_flat = fused_decoder_ce(
            x, self.decoder_w_active, labels, inv_n=inv_n)
        decoded_targets = logits_flat.reshape(B, S, self.vocab_size)
        return loss, decoded_targets


if __name__ == "__main__":
    key = jax.random.PRNGKey(0)
    k_param, k_inp = jax.random.split(key)
    B, S, V = 2, 8, 256
    model = ServerPallas(k_param, vocab_size=V, pre_dim=32, final_dim=64)
    inputs = jax.random.randint(k_inp, (B, S), 0, V, dtype=jnp.int32)
    loss, decoded = model.forward(inputs)
    jax.block_until_ready((loss, decoded))
    assert decoded.shape == (B, S, V) and loss.shape == ()
    assert bool(jnp.isfinite(loss))
    print("KERNEL_OK")
</pallas_src>

<mosaic_0001>
module attributes {stable_mosaic.version = 11 : i64} {
  func.func @_fused_decoder_ce_kernel(%arg0: i32, %arg1: memref<16x1xi32, #tpu.memory_space<vmem>>, %arg2: memref<16x32xbf16, #tpu.memory_space<vmem>>, %arg3: memref<32x256xbf16, #tpu.memory_space<vmem>>, %arg4: memref<16x256xf32, #tpu.memory_space<vmem>>, %arg5: memref<1x1xf32, #tpu.memory_space<vmem>>, %arg6: memref<1x1xf32, #tpu.memory_space<vmem>>) attributes {dimension_semantics = [#tpu.dimension_semantics<arbitrary>], iteration_bounds = array<i64: 1>, scalar_prefetch = 0 : i64, scratch_operands = 1 : i64, tpu.core_type = #tpu.core_type<tc>, window_params = [{transform_indices = @transform_0, window_bounds = array<i64: 16, 1>}, {transform_indices = @transform_1, window_bounds = array<i64: 16, 32>}, {pipeline_mode = #tpu.pipeline_mode<synchronous>, transform_indices = @transform_2, window_bounds = array<i64: 32, 256>}, {transform_indices = @transform_3, window_bounds = array<i64: 16, 256>}, {pipeline_mode = #tpu.pipeline_mode<synchronous>, transform_indices = @transform_4, window_bounds = array<i64: 1, 1>}]} {
    %c0_i32 = arith.constant 0 : i32
    %0 = arith.cmpi eq, %arg0, %c0_i32 : i32
    %1 = arith.extui %0 : i1 to i32
    %c0_i32_0 = arith.constant 0 : i32
    %2 = arith.cmpi ne, %1, %c0_i32_0 : i32
    scf.if %2 {
      %cst_21 = arith.constant 0.000000e+00 : f32
      %37 = vector.broadcast %cst_21 : f32 to vector<1x1xf32>
      %c0_22 = arith.constant 0 : index
      %c0_23 = arith.constant 0 : index
      %38 = vector.load %arg6[%c0_22, %c0_23] : memref<1x1xf32, #tpu.memory_space<vmem>>, vector<1x1xf32>
      tpu.vector_store %arg6[%c0_22, %c0_23], %37 {strides = array<i32>} : memref<1x1xf32, #tpu.memory_space<vmem>>, vector<1x1xf32>,
    } else {
    }
    %c0 = arith.constant 0 : index
    %c0_1 = arith.constant 0 : index
    %3 = vector.load %arg2[%c0, %c0_1] : memref<16x32xbf16, #tpu.memory_space<vmem>>, vector<16x32xbf16>
    %c0_2 = arith.constant 0 : index
    %c0_3 = arith.constant 0 : index
    %4 = vector.load %arg3[%c0_2, %c0_3] : memref<32x256xbf16, #tpu.memory_space<vmem>>, vector<32x256xbf16>
    %cst = arith.constant dense<0.000000e+00> : vector<16x256xf32>
    %5 = tpu.matmul %3, %4, %cst {dimension_numbers = #tpu.dot_dimension_numbers<[1], [0], [0], [1], [0, 0, 1, 1], [], []>} : vector<16x32xbf16>, vector<32x256xbf16>, vector<16x256xf32> -> vector<16x256xf32>
    %c0_4 = arith.constant 0 : index
    %c0_5 = arith.constant 0 : index
    %6 = vector.load %arg4[%c0_4, %c0_5] : memref<16x256xf32, #tpu.memory_space<vmem>>, vector<16x256xf32>
    tpu.vector_store %arg4[%c0_4, %c0_5], %5 {strides = array<i32>} : memref<16x256xf32, #tpu.memory_space<vmem>>, vector<16x256xf32>,
    %c0_6 = arith.constant 0 : index
    %c0_7 = arith.constant 0 : index
    %7 = vector.load %arg1[%c0_6, %c0_7] : memref<16x1xi32, #tpu.memory_space<vmem>>, vector<16x1xi32>
    %c0_i32_8 = arith.constant 0 : i32
    %8 = vector.broadcast %c0_i32_8 : i32 to vector<16x1xi32>
    %9 = arith.cmpi sge, %7, %8 : vector<16x1xi32>
    %cst_9 = arith.constant dense<0xFF800000> : vector<16xf32>
    %10 = vector.multi_reduction <maximumf>, %5, %cst_9 [1] : vector<16x256xf32> to vector<16xf32>
    %11 = vector.shape_cast %10 : vector<16xf32> to vector<16x1xf32>
    %12 = vector.broadcast %11 : vector<16x1xf32> to vector<16x256xf32>
    %13 = arith.subf %5, %12 : vector<16x256xf32>
    %14 = math.exp %13 : vector<16x256xf32>
    %cst_10 = arith.constant dense<0.000000e+00> : vector<16xf32>
    %15 = vector.multi_reduction <add>, %14, %cst_10 [1] : vector<16x256xf32> to vector<16xf32>
    %16 = vector.shape_cast %15 : vector<16xf32> to vector<16x1xf32>
    %17 = math.log %16 : vector<16x1xf32>
    %18 = arith.addf %11, %17 : vector<16x1xf32>
    %19 = tpu.iota {dimensions = array<i32: 1>} : vector<16x256xi32>
    %20 = vector.broadcast %7 : vector<16x1xi32> to vector<16x256xi32>
    %21 = arith.cmpi eq, %19, %20 : vector<16x256xi32>
    %cst_11 = arith.constant 0.000000e+00 : f32
    %22 = vector.broadcast %cst_11 : f32 to vector<16x256xf32>
    %23 = arith.select %21, %5, %22 : vector<16x256xi1>, vector<16x256xf32>
    %cst_12 = arith.constant dense<0.000000e+00> : vector<16xf32>
    %24 = vector.multi_reduction <add>, %23, %cst_12 [1] : vector<16x256xf32> to vector<16xf32>
    %25 = vector.shape_cast %24 : vector<16xf32> to vector<16x1xf32>
    %26 = arith.subf %18, %25 : vector<16x1xf32>
    %cst_13 = arith.constant 0.000000e+00 : f32
    %27 = vector.broadcast %cst_13 : f32 to vector<16x1xf32>
    %28 = arith.select %9, %26, %27 : vector<16x1xi1>, vector<16x1xf32>
    %c0_14 = arith.constant 0 : index
    %c0_15 = arith.constant 0 : index
    %29 = vector.load %arg6[%c0_14, %c0_15] : memref<1x1xf32, #tpu.memory_space<vmem>>, vector<1x1xf32>
    %cst_16 = arith.constant dense<0.000000e+00> : vector<1xf32>
    %30 = vector.multi_reduction <add>, %28, %cst_16 [0] : vector<16x1xf32> to vector<1xf32>
    %31 = vector.shape_cast %30 : vector<1xf32> to vector<1x1xf32>
    %32 = arith.addf %29, %31 : vector<1x1xf32>
    %c0_17 = arith.constant 0 : index
    %c0_18 = arith.constant 0 : index
    %33 = vector.load %arg6[%c0_17, %c0_18] : memref<1x1xf32, #tpu.memory_space<vmem>>, vector<1x1xf32>
    tpu.vector_store %arg6[%c0_17, %c0_18], %32 {strides = array<i32>} : memref<1x1xf32, #tpu.memory_space<vmem>>, vector<1x1xf32>,
    %c0_i32_19 = arith.constant 0 : i32
    %34 = arith.cmpi eq, %arg0, %c0_i32_19 : i32
    %35 = arith.extui %34 : i1 to i32
    %c0_i32_20 = arith.constant 0 : i32
    %36 = arith.cmpi ne, %35, %c0_i32_20 : i32
    scf.if %36 {
      %c0_21 = arith.constant 0 : index
      %c0_22 = arith.constant 0 : index
      %37 = vector.load %arg6[%c0_21, %c0_22] : memref<1x1xf32, #tpu.memory_space<vmem>>, vector<1x1xf32>
      %cst_23 = arith.constant 0.0714285746 : f32
      %38 = vector.broadcast %cst_23 : f32 to vector<1x1xf32>
      %39 = arith.mulf %37, %38 : vector<1x1xf32>
      %c0_24 = arith.constant 0 : index
      %c0_25 = arith.constant 0 : index
      %40 = vector.load %arg5[%c0_24, %c0_25] : memref<1x1xf32, #tpu.memory_space<vmem>>, vector<1x1xf32>
      tpu.vector_store %arg5[%c0_24, %c0_25], %39 {strides = array<i32>} : memref<1x1xf32, #tpu.memory_space<vmem>>, vector<1x1xf32>,
    } else {
    }
    return
  }
  func.func @transform_0(%arg0: i32) -> (i32, i32) {
    %c0_i32 = arith.constant 0 : i32
    %c0_i32_0 = arith.constant 0 : i32
    return %arg0, %c0_i32 : i32, i32
  }
  func.func @transform_1(%arg0: i32) -> (i32, i32) {
    %c0_i32 = arith.constant 0 : i32
    %c0_i32_0 = arith.constant 0 : i32
    return %arg0, %c0_i32 : i32, i32
  }
  func.func @transform_2(%arg0: i32) -> (i32, i32) {
    %c0_i32 = arith.constant 0 : i32
    %c0_i32_0 = arith.constant 0 : i32
    %c0_i32_1 = arith.constant 0 : i32
    return %c0_i32, %c0_i32_0 : i32, i32
  }
  func.func @transform_3(%arg0: i32) -> (i32, i32) {
    %c0_i32 = arith.constant 0 : i32
    %c0_i32_0 = arith.constant 0 : i32
    return %arg0, %c0_i32 : i32, i32
  }
  func.func @transform_4(%arg0: i32) -> (i32, i32) {
    %c0_i32 = arith.constant 0 : i32
    %c0_i32_0 = arith.constant 0 : i32
    %c0_i32_1 = arith.constant 0 : i32
    return %c0_i32, %c0_i32_0 : i32, i32
  }
}

</mosaic_0001>

<bundles_post_ra>
// kernel: tpu_custom_call.1
= control target key start
LH: loop header
LB: loop body
LE: loop exit
PB: predicated region body
PF: predicated region fallthrough
CT: control target
= control target key end

     0   :  { %10 = vsyncpa [#allocation4], 0  ;;  %s431_s0 = inlined_call_operand.vmem [shape: s32[16,1], index: 0, kind: input, shape index: {}]   ;;  %s432_s1 = inlined_call_operand.vmem [shape: bf16[16,32], index: 1, kind: input, shape index: {}]   ;;  %s433_s2 = inlined_call_operand.hbm [shape: bf16[32,256], index: 2, kind: input, shape index: {}]   ;;  %s434_s3 = inlined_call_operand.hbm [shape: f32[16,256], index: 3, kind: output, shape index: {0}]   ;;  %s435_s4 = inlined_call_operand.hbm [shape: f32[1,1], index: 4, kind: output, shape index: {1}]  }
   0x1   :  { %11 = vsyncpa [#allocation5], 0 }
   0x2   :  { %12 = vsyncpa [#allocation8], 0  ;;  %s341_s15 = smov [#allocation3]   ;;  %s269_s19 = scalar_lea.hbm %s433_s2, 512 }
   0x3   :  { %s22_s16 = sshll.u32 %s341_s15, 4  ;;  %p270_p0 = scmp.ne.s32.totalorder %s433_s2, %s269_s19  ;;  %s23_s16 = int_to_ptr.vmem [resolvable:$true] %s22_s16 }
   0x4   :  { %p273_p1 = scmp.lt.u32.totalorder %s269_s19, %s433_s2 }
   0x6   :  { %p275_p2 = pnand %p273_p1, %p270_p0 }
   0x8   :  { %278 = shalt.err (!%p275_p2)
}
   0x9   :  { %s279_s24 = scalar_lea.vmem %s23_s16, 512  ;;  %p284_p4 = scmp.lt.s32.totalorder %s23_s16, %s23_s16 }
   0xa   :  { %p280_p3 = scmp.ne.s32.totalorder %s23_s16, %s279_s24  ;;  %p285_p5 = scmp.lt.s32.totalorder %s279_s24, %s279_s24 }
   0xc   :  { %p286_p6 = por %p285_p5, %p284_p4 }
   0xe   :  { %p287_p7 = pnand %p286_p6, %p280_p3 }
  0x10   :  { %290 = shalt.err (!%p287_p7)
}
  0x11   :  { %s342_s25 = smov 128   ;;  %s343_s26 = smov 8  }
  0x12   :  { %28 = dma.hbm_to_vmem [thread:$0]  %s433_s2, 512, %s23_s16, [#allocation4], %s342_s25, %s342_s25, %s343_s26  }
  0x13   :  { %335 = dma.done.wait [#allocation4], 512  }
  0x14   :  { %336 = vsyncadd [#allocation4], 4294966784  ;;  %v344_v0 = vmov 0   ;;  %v250_v1 = vld [vmem:[#allocation3 + $0x4] ss:$8 sps:$4 sm:$0xff]   ;;  %vm70_vm0 = vcmask 261120   ;;  %v155_v8 = vlaneseq }
  0x15   :  { %106 = vmatprep.mubr.bf16.mxu0 %v344_v0  ;;  %248 = vset.pattern.permute.xlu1 %v344_v0  ;;  %v252_v2 = vld [vmem:[#allocation3] ss:$8 sps:$4 sm:$0xff]   ;;  %v253_v3 = vld [vmem:[#allocation3 + $0x14] ss:$8 sps:$4 sm:$0xff]   ;;  %v255_v4 = vld [vmem:[#allocation3 + $0x10] ss:$8 sps:$4 sm:$0xff]  }
  0x16   :  { %249 = vset.pattern.permute.xlu0 %v344_v0  ;;  %74 = vmatprep.subr.bf16.mxu0 %v250_v1  ;;  %v390_v5 = vld [vmem:[%s431_s0] sm:$0xff]  ;;  %v396_v6 = vld [vmem:[%s431_s0 + $0x8] sm:$0xff]  ;;  %v156_v9 = vand.u32 127, %v155_v8  ;;  %vm37_vm5 = vcmask 0   ;;  %v345_v41 = vmov 0.0   ;;  %s346_s0 = smov [#allocation6]  }
  0x17   :  { %75 = vmatpush1.bf16.msra.mxu0 %v252_v2  ;;  %159 = vperm.xlu1 %248, %v390_v5   ;;  %v256_v7 = vld [vmem:[%s432_s1] sm:$0xff]   ;;  %38 = vst.msk [vmem:[#allocation2] sm:$0x1] %vm37_vm5, %v345_v41  ;;  %s207_s1 = sshll.u32 %s346_s0, 4  ;;  %s208_s1 = int_to_ptr.vmem [resolvable:$true] %s207_s1 }
  0x18   :  { %76 = vmatprep.subr.bf16.mxu0 %v253_v3  ;;  %v157_v11 = vadd.s32 128, %v156_v9  ;;  %s291_s8 = scalar_lea.vmem %s208_s1, 512  ;;  %p296_p9 = scmp.lt.s32.totalorder %s208_s1, %s208_s1 }
  0x19   :  { %p292_p8 = scmp.ne.s32.totalorder %s208_s1, %s291_s8  ;;  %p297_p10 = scmp.lt.s32.totalorder %s291_s8, %s291_s8 }
  0x1b   :  { %77 = vmatpush1.bf16.msra.mxu0 %v255_v4  ;;  %162 = vperm.xlu1 %248, %v396_v6   ;;  %p298_p11 = por %p297_p10, %p296_p9 }
  0x1d   :  { %p299_p12 = pnand %p298_p11, %p292_p8 }
  0x1e   :  { %238 = vmatmul.mubr.msk.bf16.vlgmr.msra.gmra.mrb[0].mxu0 %vm70_vm0, %v256_v7 }
  0x96   :  { %v160_v10 = vpop.permute.xlu1 %159 }
  0x97   :  { %vm164_vm1 = vcmp.eq.s32.totalorder %v156_v9, %v160_v10  ;;  %vm165_vm2 = vcmp.eq.s32.totalorder %v157_v11, %v160_v10 }
  0x9a   :  { %v163_v12 = vpop.permute.xlu1 %162 }
  0x9b   :  { %vm166_vm3 = vcmp.eq.s32.totalorder %v156_v9, %v163_v12  ;;  %vm167_vm4 = vcmp.eq.s32.totalorder %v157_v11, %v163_v12 }
  0xf1   :  { %v108_v13 = vpop.f32.mrb[0].mxu0 }
  0xf2   :  { %117 = vst [vmem:[#allocation6] sm:$0xff] %v108_v13  ;;  %v110_v14 = vpop.f32.mrb[1].mxu0  ;;  %v168_v15 = vsel %vm164_vm1, %v108_v13, 0.0 }
  0xf3   :  { %118 = vst [vmem:[#allocation6 + $0x8] sm:$0xff] %v110_v14  ;;  %v112_v16 = vpop.f32.mrb[2].mxu0  ;;  %v125_v17 = vmax.f32 %v108_v13, %v110_v14  ;;  %v169_v18 = vsel %vm165_vm2, %v110_v14, 0.0 }
  0xf4   :  { %119 = vst [vmem:[#allocation6 + $0x10] sm:$0xff] %v112_v16  ;;  %v114_v19 = vpop.f32.mrb[3].mxu0  ;;  %v172_v20 = vadd.f32 %v169_v18, %v168_v15  ;;  %v170_v21 = vsel %vm166_vm3, %v112_v16, 0.0 }
  0xf5   :  { %120 = vst [vmem:[#allocation6 + $0x18] sm:$0xff] %v114_v19  ;;  %126 = vmax.xlane.f32.xlu0 %v125_v17  ;;  %v128_v22 = vmax.f32 %v112_v16, %v114_v19  ;;  %v171_v23 = vsel %vm167_vm4, %v114_v19, 0.0 }
  0xf6   :  { %v175_v24 = vadd.f32 %v171_v23, %v170_v21 }
  0xf9   :  { %129 = vmax.xlane.f32.xlu0 %v128_v22 }
 0x182   :  { %v127_v25 = vpop.xlane.xlu0 %126 }
 0x183   :  { %v131_v26 = vsub.f32 %v108_v13, %v127_v25  ;;  %v132_v27 = vsub.f32 %v110_v14, %v127_v25 }
 0x185   :  { %v135_v28 = vmul.f32 1.442695, %v131_v26  ;;  %v137_v29 = vmul.f32 1.442695, %v132_v27 }
 0x186   :  { %v130_v30 = vpop.xlane.xlu0 %129 }
 0x187   :  { %257 = vpow2.f32 %v135_v28  ;;  %v133_v31 = vsub.f32 %v112_v16, %v130_v30  ;;  %v134_v32 = vsub.f32 %v114_v19, %v130_v30 }
 0x188   :  { %259 = vpow2.f32 %v137_v29 }
 0x189   :  { %v139_v33 = vmul.f32 1.442695, %v133_v31  ;;  %v141_v34 = vmul.f32 1.442695, %v134_v32 }
 0x18b   :  { %261 = vpow2.f32 %v139_v33 }
 0x18c   :  { %263 = vpow2.f32 %v141_v34 }
 0x191   :  { %v258_v35 = vpop.eup %257 }
 0x192   :  { %v260_v36 = vpop.eup %259 }
 0x193   :  { %v143_v37 = vadd.f32 %v260_v36, %v258_v35 }
 0x195   :  { %v262_v38 = vpop.eup %261  ;;  %144 = vadd.xlane.f32.xlu0 %v143_v37 }
 0x196   :  { %v264_v39 = vpop.eup %263 }
 0x197   :  { %v146_v40 = vadd.f32 %v264_v39, %v262_v38 }
 0x199   :  { %173 = vadd.xlane.f32.xlu0 %v172_v20  ;;  %147 = vadd.xlane.f32.xlu1 %v146_v40 }
 0x19d   :  { %176 = vadd.xlane.f32.xlu0 %v175_v24 }
 0x19e   :  { %302 = shalt.err (!%p299_p12)
}
 0x19f   :  { %s303_s11 = scalar_lea.hbm %s434_s3, 512 }
 0x1a0   :  { %p304_p13 = scmp.ne.s32.totalorder %s434_s3, %s303_s11  ;;  %p307_p0 = scmp.lt.u32.totalorder %s303_s11, %s434_s3 }
 0x1a2   :  { %p309_p1 = pnand %p307_p0, %p304_p13 }
 0x1a4   :  { %312 = shalt.err (!%p309_p1)
}
 0x1a5   :  { %s347_s16 = smov 256   ;;  %s348_s17 = smov 16   ;;  %vm123_vm6 = vcmp.ge.s32.totalorder %v390_v5, 0  ;;  %vm124_vm7 = vcmp.ge.s32.totalorder %v396_v6, 0  ;;  %vm183_vm8 = vcmask 7168  }
 0x1a6   :  { %213 = dma.vmem_to_hbm [thread:$0]  %s208_s1, 512, %s434_s3, [#allocation5], %s347_s16, %s347_s16, %s348_s17   ;;  %v182_v0 = vld [vmem:[#allocation2] sm:$0x1] }
 0x1a7   :  { %s349_s3 = smov [#allocation7]  }
 0x1a8   :  { %s220_s20 = sshll.u32 %s349_s3, 4  ;;  %s221_s20 = int_to_ptr.vmem [resolvable:$true] %s220_s20 }
 0x1a9   :  { %s313_s21 = scalar_lea.vmem %s221_s20, 16  ;;  %s317_s22 = scalar_lea.vmem %s221_s20, 32 }
 0x1aa   :  { %p314_p2 = scmp.ne.s32.totalorder %s221_s20, %s313_s21  ;;  %p318_p3 = scmp.lt.s32.totalorder %s221_s20, %s221_s20 }
 0x1ab   :  { %p319_p4 = scmp.lt.s32.totalorder %s317_s22, %s313_s21 }
 0x1ad   :  { %p320_p5 = por %p319_p4, %p318_p3 }
 0x1af   :  { %p321_p6 = pnand %p320_p5, %p314_p2 }
 0x222   :  { %v145_v42 = vpop.xlane.xlu0 %144 }
 0x223   :  { %265 = vlog2.f32 %v145_v42 }
 0x226   :  { %v148_v43 = vpop.xlane.xlu1 %147  ;;  %v174_v46 = vpop.xlane.xlu0 %173 }
 0x227   :  { %267 = vlog2.f32 %v148_v43 }
 0x22a   :  { %v177_v52 = vpop.xlane.xlu0 %176 }
 0x22d   :  { %v266_v44 = vpop.eup %265 }
 0x22e   :  { %v150_v45 = vmul.f32 0.6931472, %v266_v44 }
 0x230   :  { %v153_v47 = vadd.f32 %v150_v45, %v127_v25 }
 0x231   :  { %v268_v48 = vpop.eup %267 }
 0x232   :  { %v152_v49 = vmul.f32 0.6931472, %v268_v48  ;;  %v178_v50 = vsub.f32 %v153_v47, %v174_v46 }
 0x234   :  { %v154_v51 = vadd.f32 %v152_v49, %v130_v30  ;;  %v180_v53 = vsel %vm123_vm6, %v178_v50, 0.0 }
 0x235   :  { %v184_v56 = vsel %vm183_vm8, %v180_v53, 0.0 }
 0x236   :  { %v179_v54 = vsub.f32 %v154_v51, %v177_v52 }
 0x238   :  { %v181_v55 = vsel %vm124_vm7, %v179_v54, 0.0 }
 0x239   :  { %v185_v57 = vsel %vm183_vm8, %v181_v55, 0.0 }
 0x23a   :  { %v186_v58 = vadd.f32 %v185_v57, %v184_v56 }
 0x23c   :  { %v187_v59 = vrot.slane %v186_v58, 4 }
 0x23e   :  { %v188_v60 = vadd.f32 %v187_v59, %v186_v58 }
 0x240   :  { %v189_v61 = vrot.slane %v188_v60, 2 }
 0x242   :  { %v190_v62 = vadd.f32 %v189_v61, %v188_v60 }
 0x244   :  { %v191_v63 = vrot.slane %v190_v62, 1 }
 0x246   :  { %v192_v1 = vadd.f32 %v191_v63, %v190_v62 }
 0x248   :  { %v193_v2 = vadd.f32 %v192_v1, %v182_v0 }
 0x24a   :  { %195 = vst.msk [vmem:[#allocation2] sm:$0x1] %vm37_vm5, %v193_v2 }
 0x251   :  { %v199_v3 = vld [vmem:[#allocation2] sm:$0x1] }
 0x252   :  { %v200_v4 = vmul.f32 0.071428575, %v199_v3 }
 0x254   :  { %201 = vst.msk [vmem:[#allocation7] sm:$0x1] %vm37_vm5, %v200_v4 }
 0x255   :  { %324 = shalt.err (!%p321_p6)
}
 0x256   :  { %s325_s25 = scalar_lea.hbm %s435_s4, 16 }
 0x257   :  { %p326_p7 = scmp.ne.s32.totalorder %s435_s4, %s325_s25  ;;  %p329_p8 = scmp.lt.u32.totalorder %s325_s25, %s435_s4 }
 0x259   :  { %p331_p9 = pnand %p329_p8, %p326_p7 }
 0x25b   :  { %334 = shalt.err (!%p331_p9)
}
 0x25c   :  { %223 = dma.vmem_to_hbm [thread:$0]  %s221_s20, 16, %s435_s4, [#allocation8]  }
 0x25d   :  { %337 = dma.done.wait [#allocation5], 512  }
 0x25e   :  { %338 = vsyncadd [#allocation5], 4294966784 }
 0x25f   :  { %339 = dma.done.wait [#allocation8], 16  }
 0x260   :  { %340 = vsyncadd [#allocation8], 4294967280 }
 0x261   :  { %230 = vsyncpa [#allocation4], 1 }
 0x262   :  { %231 = vsyncpa [#allocation5], 1 }
 0x263   :  { %232 = vsyncpa [#allocation8], 1 }

</bundles_post_ra>
